<compile_context>
chip_gen: v7x
topology: tpu7x:2x2x1
jax: 0.10.0
libtpu: 0.0.40
codegen_flags: <defaults>
</compile_context>

<pallas_src>
import jax
import jax.numpy as jnp
import numpy as np
from jax.experimental import pallas as pl
from jax.experimental.pallas import tpu as pltpu


# ---------------------------------------------------------------------------
# Model configuration (small, deterministic)
# ---------------------------------------------------------------------------
VOCAB = 1000
USER_FIELDS = 2
ITEM_FIELDS = 2
CTX_FIELDS = 1
HIST_FIELDS = 2
EMBED_DIM = 8
HIDDEN_DIMS = (32, 16)
H1, H2 = HIDDEN_DIMS
KLG_ENC_DIM = 4
KLG_NUM_FIELDS = 2                      # (|klg_user|+|klg_hist|) * |klg_item| * |klg_ctx|
KLG_VEC_DIM = KLG_NUM_FIELDS * KLG_ENC_DIM   # 8

D_USER = USER_FIELDS * EMBED_DIM        # 16
D_ITEM = ITEM_FIELDS * EMBED_DIM        # 16
D_CTX = CTX_FIELDS * EMBED_DIM          # 8
D_HIST = HIST_FIELDS * EMBED_DIM        # 16
D_STATIC = D_ITEM + D_USER + D_CTX      # 40  (static emb lanes, order [item|user|ctx])
MLP_DIM = D_USER + D_ITEM + D_CTX + D_HIST + KLG_VEC_DIM   # 64 (row dim of w1)

B = 16                                  # batch
T = 8                                   # history length
D_HIST_FLAT = T * D_HIST                # 128  (lane-dense, exactly one vreg column)
N_GATHER_FIELDS = T * HIST_FIELDS + ITEM_FIELDS + USER_FIELDS + CTX_FIELDS   # 21
D_EMB_ALL = N_GATHER_FIELDS * EMBED_DIM                                      # 168

# --- packed parameter slab layout (all row offsets 8-aligned) --------------
SLAB_COLS = 128
R_WATT = 0                              # watt tiled across T groups   (16, 128)
R_W1S = R_WATT + D_ITEM                 # w1 static rows [item|user|ctx] (40, 32)
R_W1K = R_W1S + D_STATIC                # w1 klg rows                    (8, 32)
R_W1H = R_W1K + KLG_VEC_DIM             # w1 user_rep rows               (16, 32)
R_W2 = R_W1H + D_HIST                   # w2                             (32, 16)
R_SSUM = R_W2 + H1                      # block-sum selector             (128, 8)
R_SGATH = R_SSUM + D_HIST_FLAT          # stacked-identity gather        (128, 16)
R_SEXP = R_SGATH + D_HIST_FLAT          # alpha lane-expand selector     (8, 128)
R_BATT = R_SEXP + 8                     # batt tiled                     (1, 128)
R_B1 = R_BATT + 8                       # b1                             (1, 32)
R_B2 = R_B1 + 8                         # b2                             (1, 16)
R_WO = R_B2 + 8                         # wo row                         (1, 16)
R_BO = R_WO + 8                         # bo                             (1, 1)
SLAB_ROWS = R_BO + 8                    # 416  (~208 KB f32, trivial VMEM)


# ---------------------------------------------------------------------------
# Pallas kernel: attention + masked softmax + MLP + sigmoid (single step)
# ---------------------------------------------------------------------------
def din_klg_kernel(hist_len_ref, emb_ref, klg_ref, p_ref, out_ref):
    # emb_ref lanes: [hist (0:128) | item (128:144) | user (144:160) | ctx (160:168)]
    hist = emb_ref[:, 0:D_HIST_FLAT]                       # (B, 128), vreg-aligned
    static = emb_ref[:, D_HIST_FLAT:]                      # (B, 40),  starts at lane 128
    item = static[:, :D_ITEM]                              # (B, 16),  lane 0 of that vreg
    klg = klg_ref[...]                                     # (B, 8)

    # --- HistAttProd query, tiled across all T lane-groups: one MXU dot -----
    watt_t = p_ref[R_WATT:R_WATT + D_ITEM, :]              # (16, 128) = watt tiled x T
    batt_t = p_ref[R_BATT:R_BATT + 1, :]                   # (1, 128)  = batt tiled x T
    q_tiled = jnp.dot(item, watt_t, preferred_element_type=jnp.float32) + batt_t  # (B,128)

    # --- attention scores via block-sum selector matmul (MXU, no XLU loops) --
    s_sum = p_ref[R_SSUM:R_SSUM + D_HIST_FLAT, :T]         # (128, 8) 0/1 block-sum
    scores = jnp.dot(hist * q_tiled, s_sum,
                     preferred_element_type=jnp.float32)   # (B, T)

    # --- length mask + softmax (kept in-kernel: 3 cheap VPU ops) -------------
    t_idx = jax.lax.broadcasted_iota(jnp.int32, (B, T), 1)
    scores = jnp.where(t_idx < hist_len_ref[...], scores, jnp.float32(-1e9))
    m = jnp.max(scores, axis=-1, keepdims=True)
    e = jnp.exp(scores - m)
    # exact reciprocal: keeps the 1e-5 comparison against the reference safe
    alpha = e * pl.reciprocal(jnp.sum(e, axis=-1, keepdims=True), approx=False)

    # --- weighted history sum via selector matmuls (MXU) ---------------------
    s_exp = p_ref[R_SEXP:R_SEXP + T, :]                    # (8, 128) lane-expand
    alpha_x = jnp.dot(alpha, s_exp, preferred_element_type=jnp.float32)       # (B, 128)
    s_gath = p_ref[R_SGATH:R_SGATH + D_HIST_FLAT, :D_HIST]                    # (128, 16)
    user_rep = jnp.dot(alpha_x * hist, s_gath, preferred_element_type=jnp.float32)  # (B,16)

    # --- MLP: first layer as three row-block matmuls (no in-kernel concat) ---
    w1s = p_ref[R_W1S:R_W1S + D_STATIC, :H1]               # (40, 32) [item|user|ctx] rows
    w1k = p_ref[R_W1K:R_W1K + KLG_VEC_DIM, :H1]            # (8, 32)  klg rows
    w1h = p_ref[R_W1H:R_W1H + D_HIST, :H1]                 # (16, 32) user_rep rows
    b1 = p_ref[R_B1:R_B1 + 1, :H1]                         # (1, 32)
    h = (jnp.dot(static, w1s, preferred_element_type=jnp.float32)
         + jnp.dot(user_rep, w1h, preferred_element_type=jnp.float32)
         + jnp.dot(klg, w1k, preferred_element_type=jnp.float32) + b1)
    h = jnp.maximum(h, 0.0)

    w2 = p_ref[R_W2:R_W2 + H1, :H2]                        # (32, 16)
    b2 = p_ref[R_B2:R_B2 + 1, :H2]                         # (1, 16)
    h = jnp.dot(h, w2, preferred_element_type=jnp.float32) + b2
    h = jnp.maximum(h, 0.0)

    # --- output layer in row form (1, B). Single tiny store at B=16; pad the
    #     per-tile output width to a multiple of 128 only once B grows. -------
    wo = p_ref[R_WO:R_WO + 1, :H2]                         # (1, 16)
    bo = p_ref[R_BO:R_BO + 1, 0:1]                         # (1, 1)
    logit = jax.lax.dot_general(wo, h, (((1,), (1,)), ((), ())),
                                preferred_element_type=jnp.float32) + bo      # (1, B)
    out_ref[...] = jax.nn.sigmoid(logit)


def din_klg_pallas(hist_len_2d, emb_all, klg, slab):
    vmem = pltpu.MemorySpace.VMEM
    out = pl.pallas_call(
        din_klg_kernel,
        out_shape=jax.ShapeDtypeStruct((1, B), jnp.float32),
        # No grid: one kernel invocation, whole arrays resident in VMEM,
        # no pipeline prologue/epilogue or double buffering.
        in_specs=[
            pl.BlockSpec(memory_space=vmem),   # hist_len (B, 1) int32
            pl.BlockSpec(memory_space=vmem),   # emb_all  (B, 168)
            pl.BlockSpec(memory_space=vmem),   # klg      (B, 8)
            pl.BlockSpec(memory_space=vmem),   # slab     (416, 128)
        ],
        out_specs=pl.BlockSpec(memory_space=vmem),
    )(hist_len_2d, emb_all, klg, slab)
    return out[0]


# ---------------------------------------------------------------------------
# One-time parameter packing (numpy, outside jit / outside the hot path)
# ---------------------------------------------------------------------------
def pack_param_slab(params):
    """Pack all weights, biases and constant selector matrices into one
    padded (SLAB_ROWS, 128) f32 slab. Built ONCE at init."""
    watt = np.asarray(params['watt'], np.float32)          # (16, 16)
    batt = np.asarray(params['batt'], np.float32)          # (1, 16)
    w1 = np.asarray(params['w1'], np.float32)              # (64, 32)
    # w1 row blocks: [user(0:16) | item(16:32) | ctx(32:40) | user_rep(40:56) | klg(56:64)]
    r_item0, r_ctx0, r_hist0, r_klg0 = D_USER, D_USER + D_ITEM, D_STATIC, D_STATIC + D_HIST
    w1_static = np.concatenate([w1[r_item0:r_ctx0],        # item rows
                                w1[0:r_item0],              # user rows
                                w1[r_ctx0:r_hist0]], 0)     # ctx rows   -> (40, 32)
    w1_hist = w1[r_hist0:r_klg0]                            # (16, 32)
    w1_klg = w1[r_klg0:]                                    # (8, 32)

    eye_t = np.eye(T, dtype=np.float32)
    s_sum = np.repeat(eye_t, D_HIST, axis=0)                # (128, 8)
    s_gather = np.tile(np.eye(D_HIST, dtype=np.float32), (T, 1))   # (128, 16)

    slab = np.zeros((SLAB_ROWS, SLAB_COLS), np.float32)
    slab[R_WATT:R_WATT + D_ITEM, :] = np.tile(watt, (1, T))
    slab[R_W1S:R_W1S + D_STATIC, :H1] = w1_static
    slab[R_W1K:R_W1K + KLG_VEC_DIM, :H1] = w1_klg
    slab[R_W1H:R_W1H + D_HIST, :H1] = w1_hist
    slab[R_W2:R_W2 + H1, :H2] = np.asarray(params['w2'], np.float32)
    slab[R_SSUM:R_SSUM + D_HIST_FLAT, :T] = s_sum
    slab[R_SGATH:R_SGATH + D_HIST_FLAT, :D_HIST] = s_gather
    slab[R_SEXP:R_SEXP + T, :] = s_sum.T
    slab[R_BATT, :] = np.tile(batt, (1, T))[0]
    slab[R_B1, :H1] = np.asarray(params['b1'], np.float32)[0]
    slab[R_B2, :H2] = np.asarray(params['b2'], np.float32)[0]
    slab[R_WO, :H2] = np.asarray(params['wo'], np.float32)[:, 0]
    slab[R_BO, 0] = np.asarray(params['bo'], np.float32)[0, 0]
    return jnp.asarray(slab)


# ---------------------------------------------------------------------------
# Forward: single fused embedding gather + Pallas kernel
# ---------------------------------------------------------------------------
def forward(slab, emb_table, x_user, x_item, x_context, user_hist, hist_len, klg):
    # ONE fused gather; index order [hist | item | user | ctx] makes the history
    # lanes 0:128 and the static lanes 128:168 both vreg-aligned in the kernel.
    all_idx = jnp.concatenate(
        [user_hist.reshape(B, T * HIST_FIELDS), x_item, x_user, x_context], axis=1)   # (B, 21)
    emb_all = jnp.take(emb_table, all_idx, axis=0).reshape(B, D_EMB_ALL)               # (B, 168)
    hist_len_2d = hist_len.reshape(B, 1).astype(jnp.int32)
    return din_klg_pallas(hist_len_2d, emb_all, klg.astype(jnp.float32), slab)


def forward_ref(params, x_user, x_item, x_context, user_hist, hist_len, klg):
    """Pure-JAX reference (mirrors the PyTorch forward)."""
    emb = params['emb']
    user_emb = jnp.take(emb, x_user, axis=0).reshape(B, D_USER)
    item_emb = jnp.take(emb, x_item, axis=0).reshape(B, D_ITEM)
    ctx_emb = jnp.take(emb, x_context, axis=0).reshape(B, D_CTX)
    hist_emb = jnp.take(emb, user_hist, axis=0).reshape(B, T, D_HIST)

    q = item_emb @ params['watt'] + params['batt']
    scores = jnp.einsum('btd,bd->bt', hist_emb, q)
    mask = jnp.arange(T)[None, :] < hist_len[:, None]
    scores = jnp.where(mask, scores, -1e9)
    alpha = jax.nn.softmax(scores, axis=-1)
    user_rep = jnp.einsum('bt,btd->bd', alpha, hist_emb)

    inp = jnp.concatenate([user_emb, item_emb, ctx_emb, user_rep, klg], axis=1)
    h = jax.nn.relu(inp @ params['w1'] + params['b1'])
    h = jax.nn.relu(h @ params['w2'] + params['b2'])
    logit = h @ params['wo'] + params['bo']
    return jax.nn.sigmoid(logit)[:, 0]


# ---------------------------------------------------------------------------
# Deterministic parameter / input construction
# ---------------------------------------------------------------------------
def make_params(key):
    ks = jax.random.split(key, 8)
    s = 0.1
    return {
        'emb':  jax.random.normal(ks[0], (VOCAB, EMBED_DIM), jnp.float32) * s,
        'watt': jax.random.normal(ks[1], (D_ITEM, D_HIST), jnp.float32) * s,
        'batt': jax.random.normal(ks[2], (1, D_HIST), jnp.float32) * s,
        'w1':   jax.random.normal(ks[3], (MLP_DIM, H1), jnp.float32) * s,
        'b1':   jnp.zeros((1, H1), jnp.float32),
        'w2':   jax.random.normal(ks[4], (H1, H2), jnp.float32) * s,
        'b2':   jnp.zeros((1, H2), jnp.float32),
        'wo':   jax.random.normal(ks[5], (H2, 1), jnp.float32) * s,
        'bo':   jnp.zeros((1, 1), jnp.float32),
    }


if __name__ == "__main__":
    key = jax.random.PRNGKey(0)
    kp, k1, k2, k3, k4, k5, k6 = jax.random.split(key, 7)

    params = make_params(kp)
    x_user = jax.random.randint(k1, (B, USER_FIELDS), 0, VOCAB, dtype=jnp.int32)
    x_item = jax.random.randint(k2, (B, ITEM_FIELDS), 0, VOCAB, dtype=jnp.int32)
    x_context = jax.random.randint(k3, (B, CTX_FIELDS), 0, VOCAB, dtype=jnp.int32)
    user_hist = jax.random.randint(k4, (B, T, HIST_FIELDS), 0, VOCAB, dtype=jnp.int32)
    hist_len = jax.random.randint(k5, (B,), 1, T + 1, dtype=jnp.int32)
    klg = jax.random.normal(k6, (B, KLG_VEC_DIM), jnp.float32)

    # Parameter slab is packed ONCE at init (outside the jitted hot path).
    slab = pack_param_slab(params)
    emb_table = params['emb']

    fwd = jax.jit(forward)
    out = fwd(slab, emb_table, x_user, x_item, x_context, user_hist, hist_len, klg)
    out = jax.block_until_ready(out)

    ref = forward_ref(params, x_user, x_item, x_context, user_hist, hist_len, klg)
    np.testing.assert_allclose(np.asarray(out), np.asarray(ref), rtol=1e-5, atol=1e-5)

    print("KERNEL_OK")
</pallas_src>

<mosaic_0001>
module attributes {stable_mosaic.version = 11 : i64} {
  func.func @din_klg_kernel(%arg0: memref<16x1xi32, #tpu.memory_space<vmem>>, %arg1: memref<16x168xf32, #tpu.memory_space<vmem>>, %arg2: memref<16x8xf32, #tpu.memory_space<vmem>>, %arg3: memref<416x128xf32, #tpu.memory_space<vmem>>, %arg4: memref<1x16xf32, #tpu.memory_space<vmem>>) attributes {dimension_semantics = [], scalar_prefetch = 0 : i64, scratch_operands = 0 : i64, tpu.core_type = #tpu.core_type<tc>} {
    %c0 = arith.constant 0 : index
    %c0_0 = arith.constant 0 : index
    %0 = vector.load %arg1[%c0, %c0_0] : memref<16x168xf32, #tpu.memory_space<vmem>>, vector<16x128xf32>
    %c0_1 = arith.constant 0 : index
    %c128 = arith.constant 128 : index
    %1 = vector.load %arg1[%c0_1, %c128] : memref<16x168xf32, #tpu.memory_space<vmem>>, vector<16x40xf32>
    %2 = vector.extract_strided_slice %1 {offsets = [0, 0], sizes = [16, 16], strides = [1, 1]} : vector<16x40xf32> to vector<16x16xf32>
    %c0_2 = arith.constant 0 : index
    %c0_3 = arith.constant 0 : index
    %3 = vector.load %arg2[%c0_2, %c0_3] : memref<16x8xf32, #tpu.memory_space<vmem>>, vector<16x8xf32>
    %c0_4 = arith.constant 0 : index
    %c0_5 = arith.constant 0 : index
    %4 = vector.load %arg3[%c0_4, %c0_5] : memref<416x128xf32, #tpu.memory_space<vmem>>, vector<16x128xf32>
    %c376 = arith.constant 376 : index
    %c0_6 = arith.constant 0 : index
    %5 = vector.load %arg3[%c376, %c0_6] : memref<416x128xf32, #tpu.memory_space<vmem>>, vector<1x128xf32>
    %cst = arith.constant dense<0.000000e+00> : vector<16x128xf32>
    %6 = tpu.matmul %2, %4, %cst {dimension_numbers = #tpu.dot_dimension_numbers<[1], [0], [0], [1], [0, 0, 1, 1], [], []>} : vector<16x16xf32>, vector<16x128xf32>, vector<16x128xf32> -> vector<16x128xf32>
    %7 = vector.broadcast %5 : vector<1x128xf32> to vector<16x128xf32>
    %8 = arith.addf %6, %7 : vector<16x128xf32>
    %c112 = arith.constant 112 : index
    %c0_7 = arith.constant 0 : index
    %9 = vector.load %arg3[%c112, %c0_7] : memref<416x128xf32, #tpu.memory_space<vmem>>, vector<128x8xf32>
    %10 = arith.mulf %0, %8 : vector<16x128xf32>
    %cst_8 = arith.constant dense<0.000000e+00> : vector<16x8xf32>
    %11 = tpu.matmul %10, %9, %cst_8 {dimension_numbers = #tpu.dot_dimension_numbers<[1], [0], [0], [1], [0, 0, 1, 1], [], []>} : vector<16x128xf32>, vector<128x8xf32>, vector<16x8xf32> -> vector<16x8xf32>
    %12 = tpu.iota {dimensions = array<i32: 1>} : vector<16x8xi32>
    %c0_9 = arith.constant 0 : index
    %c0_10 = arith.constant 0 : index
    %13 = vector.load %arg0[%c0_9, %c0_10] : memref<16x1xi32, #tpu.memory_space<vmem>>, vector<16x1xi32>
    %14 = vector.broadcast %13 : vector<16x1xi32> to vector<16x8xi32>
    %15 = arith.cmpi slt, %12, %14 : vector<16x8xi32>
    %cst_11 = arith.constant -1.000000e+09 : f32
    %16 = vector.broadcast %cst_11 : f32 to vector<16x8xf32>
    %17 = arith.select %15, %11, %16 : vector<16x8xi1>, vector<16x8xf32>
    %cst_12 = arith.constant dense<0xFF800000> : vector<16xf32>
    %18 = vector.multi_reduction <maximumf>, %17, %cst_12 [1] : vector<16x8xf32> to vector<16xf32>
    %19 = vector.shape_cast %18 : vector<16xf32> to vector<16x1xf32>
    %20 = vector.broadcast %19 : vector<16x1xf32> to vector<16x8xf32>
    %21 = arith.subf %17, %20 : vector<16x8xf32>
    %22 = math.exp %21 : vector<16x8xf32>
    %cst_13 = arith.constant dense<0.000000e+00> : vector<16xf32>
    %23 = vector.multi_reduction <add>, %22, %cst_13 [1] : vector<16x8xf32> to vector<16xf32>
    %24 = vector.shape_cast %23 : vector<16xf32> to vector<16x1xf32>
    %25 = tpu.reciprocal %24 : vector<16x1xf32> -> vector<16x1xf32>
    %26 = vector.broadcast %25 : vector<16x1xf32> to vector<16x8xf32>
    %27 = arith.mulf %22, %26 : vector<16x8xf32>
    %c368 = arith.constant 368 : index
    %c0_14 = arith.constant 0 : index
    %28 = vector.load %arg3[%c368, %c0_14] : memref<416x128xf32, #tpu.memory_space<vmem>>, vector<8x128xf32>
    %cst_15 = arith.constant dense<0.000000e+00> : vector<16x128xf32>
    %29 = tpu.matmul %27, %28, %cst_15 {dimension_numbers = #tpu.dot_dimension_numbers<[1], [0], [0], [1], [0, 0, 1, 1], [], []>} : vector<16x8xf32>, vector<8x128xf32>, vector<16x128xf32> -> vector<16x128xf32>
    %c240 = arith.constant 240 : index
    %c0_16 = arith.constant 0 : index
    %30 = vector.load %arg3[%c240, %c0_16] : memref<416x128xf32, #tpu.memory_space<vmem>>, vector<128x16xf32>
    %31 = arith.mulf %29, %0 : vector<16x128xf32>
    %cst_17 = arith.constant dense<0.000000e+00> : vector<16x16xf32>
    %32 = tpu.matmul %31, %30, %cst_17 {dimension_numbers = #tpu.dot_dimension_numbers<[1], [0], [0], [1], [0, 0, 1, 1], [], []>} : vector<16x128xf32>, vector<128x16xf32>, vector<16x16xf32> -> vector<16x16xf32>
    %c16 = arith.constant 16 : index
    %c0_18 = arith.constant 0 : index
    %33 = vector.load %arg3[%c16, %c0_18] : memref<416x128xf32, #tpu.memory_space<vmem>>, vector<40x32xf32>
    %c56 = arith.constant 56 : index
    %c0_19 = arith.constant 0 : index
    %34 = vector.load %arg3[%c56, %c0_19] : memref<416x128xf32, #tpu.memory_space<vmem>>, vector<8x32xf32>
    %c64 = arith.constant 64 : index
    %c0_20 = arith.constant 0 : index
    %35 = vector.load %arg3[%c64, %c0_20] : memref<416x128xf32, #tpu.memory_space<vmem>>, vector<16x32xf32>
    %c384 = arith.constant 384 : index
    %c0_21 = arith.constant 0 : index
    %36 = vector.load %arg3[%c384, %c0_21] : memref<416x128xf32, #tpu.memory_space<vmem>>, vector<1x32xf32>
    %cst_22 = arith.constant dense<0.000000e+00> : vector<16x32xf32>
    %37 = tpu.matmul %1, %33, %cst_22 {dimension_numbers = #tpu.dot_dimension_numbers<[1], [0], [0], [1], [0, 0, 1, 1], [], []>} : vector<16x40xf32>, vector<40x32xf32>, vector<16x32xf32> -> vector<16x32xf32>
    %cst_23 = arith.constant dense<0.000000e+00> : vector<16x32xf32>
    %38 = tpu.matmul %32, %35, %cst_23 {dimension_numbers = #tpu.dot_dimension_numbers<[1], [0], [0], [1], [0, 0, 1, 1], [], []>} : vector<16x16xf32>, vector<16x32xf32>, vector<16x32xf32> -> vector<16x32xf32>
    %39 = arith.addf %37, %38 : vector<16x32xf32>
    %cst_24 = arith.constant dense<0.000000e+00> : vector<16x32xf32>
    %40 = tpu.matmul %3, %34, %cst_24 {dimension_numbers = #tpu.dot_dimension_numbers<[1], [0], [0], [1], [0, 0, 1, 1], [], []>} : vector<16x8xf32>, vector<8x32xf32>, vector<16x32xf32> -> vector<16x32xf32>
    %41 = arith.addf %39, %40 : vector<16x32xf32>
    %42 = vector.broadcast %36 : vector<1x32xf32> to vector<16x32xf32>
    %43 = arith.addf %41, %42 : vector<16x32xf32>
    %cst_25 = arith.constant 0.000000e+00 : f32
    %44 = vector.broadcast %cst_25 : f32 to vector<16x32xf32>
    %45 = arith.maximumf %43, %44 : vector<16x32xf32>
    %c80 = arith.constant 80 : index
    %c0_26 = arith.constant 0 : index
    %46 = vector.load %arg3[%c80, %c0_26] : memref<416x128xf32, #tpu.memory_space<vmem>>, vector<32x16xf32>
    %c392 = arith.constant 392 : index
    %c0_27 = arith.constant 0 : index
    %47 = vector.load %arg3[%c392, %c0_27] : memref<416x128xf32, #tpu.memory_space<vmem>>, vector<1x16xf32>
    %cst_28 = arith.constant dense<0.000000e+00> : vector<16x16xf32>
    %48 = tpu.matmul %45, %46, %cst_28 {dimension_numbers = #tpu.dot_dimension_numbers<[1], [0], [0], [1], [0, 0, 1, 1], [], []>} : vector<16x32xf32>, vector<32x16xf32>, vector<16x16xf32> -> vector<16x16xf32>
    %49 = vector.broadcast %47 : vector<1x16xf32> to vector<16x16xf32>
    %50 = arith.addf %48, %49 : vector<16x16xf32>
    %cst_29 = arith.constant 0.000000e+00 : f32
    %51 = vector.broadcast %cst_29 : f32 to vector<16x16xf32>
    %52 = arith.maximumf %50, %51 : vector<16x16xf32>
    %c400 = arith.constant 400 : index
    %c0_30 = arith.constant 0 : index
    %53 = vector.load %arg3[%c400, %c0_30] : memref<416x128xf32, #tpu.memory_space<vmem>>, vector<1x16xf32>
    %c408 = arith.constant 408 : index
    %c0_31 = arith.constant 0 : index
    %54 = vector.load %arg3[%c408, %c0_31] : memref<416x128xf32, #tpu.memory_space<vmem>>, vector<1x1xf32>
    %cst_32 = arith.constant dense<0.000000e+00> : vector<1x16xf32>
    %55 = tpu.matmul %53, %52, %cst_32 {dimension_numbers = #tpu.dot_dimension_numbers<[1], [1], [0], [0], [0, 0, 1, 0], [], []>} : vector<1x16xf32>, vector<16x16xf32>, vector<1x16xf32> -> vector<1x16xf32>
    %56 = vector.broadcast %54 : vector<1x1xf32> to vector<1x16xf32>
    %57 = arith.addf %55, %56 : vector<1x16xf32>
    %58 = arith.negf %57 : vector<1x16xf32>
    %59 = math.exp %58 : vector<1x16xf32>
    %cst_33 = arith.constant 1.000000e+00 : f32
    %60 = vector.broadcast %cst_33 : f32 to vector<1x16xf32>
    %61 = arith.addf %60, %59 : vector<1x16xf32>
    %62 = arith.divf %60, %61 : vector<1x16xf32>
    %c0_34 = arith.constant 0 : index
    %c0_35 = arith.constant 0 : index
    %63 = vector.load %arg4[%c0_34, %c0_35] : memref<1x16xf32, #tpu.memory_space<vmem>>, vector<1x16xf32>
    tpu.vector_store %arg4[%c0_34, %c0_35], %62 {strides = array<i32>} : memref<1x16xf32, #tpu.memory_space<vmem>>, vector<1x16xf32>,
    return
  }
}

</mosaic_0001>

<bundles_post_ra>
// kernel: forward.1
= control target key start
LH: loop header
LB: loop body
LE: loop exit
PB: predicated region body
PF: predicated region fallthrough
CT: control target
= control target key end

     0   :  { %vm31_vm0 = vcmask 130048   ;;  %s1482_s0 = inlined_call_operand.vmem [shape: s32[16,1], index: 0, kind: input, shape index: {}]   ;;  %s1483_s1 = inlined_call_operand.vmem [shape: f32[16,168], index: 1, kind: input, shape index: {}]   ;;  %s1484_s2 = inlined_call_operand.vmem [shape: f32[16,8], index: 2, kind: input, shape index: {}]   ;;  %s1485_s3 = inlined_call_operand.vmem [shape: f32[416,128], index: 3, kind: input, shape index: {}]   ;;  %s1486_s4 = inlined_call_operand.hbm [shape: f32[1,16], index: 4, kind: output, shape index: {}]  }
   0x1   :  { %v24_v0 = vld [vmem:[%s1485_s3] sm:$0xff]  ;;  %v25_v1 = vld [vmem:[%s1485_s3 + $0x8] sm:$0xff]  ;;  %v113_v4 = vld [vmem:[%s1485_s3 + $0x70] sm:$0xff] }
   0x2   :  { %v1268_v2 = vld [vmem:[%s1483_s1 + $0x8] sm:$0xff]  ;;  %v1090_v3 = vpack.c.bf16 %v25_v1, %v24_v0  ;;  %v114_v5 = vld [vmem:[%s1485_s3 + $0x78] sm:$0xff]  ;;  %v115_v7 = vld [vmem:[%s1485_s3 + $0x80] sm:$0xff] }
   0x3   :  { %969 = vmatprep.mubr.msk.f32.mxu1 %vm31_vm0, %v1268_v2  ;;  %v1094_v6 = vpack.c.bf16 %v114_v5, %v113_v4  ;;  %v116_v8 = vld [vmem:[%s1485_s3 + $0x88] sm:$0xff]  ;;  %v1287_v9 = vld [vmem:[%s1483_s1 + $0x18] sm:$0xff]  ;;  %v117_v11 = vld [vmem:[%s1485_s3 + $0x90] sm:$0xff] }
   0x4   :  { %1091 = vmatprep.subr.bf16.mxu1 %v1090_v3  ;;  %v1098_v10 = vpack.c.bf16 %v116_v8, %v115_v7  ;;  %v118_v12 = vld [vmem:[%s1485_s3 + $0x98] sm:$0xff] }
   0x5   :  { %1093 = vmatpush3.bf16.msra.mxu1 %v1090_v3 }
   0x6   :  { %1095 = vmatprep.subr.bf16.mxu1 %v1094_v6 }
   0x7   :  { %9 = vsyncpa [#allocation3], 0  ;;  %v1102_v13 = vpack.c.bf16 %v118_v12, %v117_v11  ;;  %v119_v14 = vld [vmem:[%s1485_s3 + $0xa0] sm:$0xff]  ;;  %v120_v15 = vld [vmem:[%s1485_s3 + $0xa8] sm:$0xff]  ;;  %v1229_v30 = vmov 0   ;;  %v206_v41 = vlaneseq  ;;  %vm220_vm2 = vcmask 64512  }
   0x8   :  { %970 = vmatmul.mubr.msk.f32.vlgmr.msra.gmra.mrb[0].mxu1 %vm31_vm0, %v1287_v9  ;;  %v1106_v16 = vpack.c.bf16 %v120_v15, %v119_v14  ;;  %v121_v17 = vld [vmem:[%s1485_s3 + $0xb0] sm:$0xff]  ;;  %v122_v18 = vld [vmem:[%s1485_s3 + $0xb8] sm:$0xff]  ;;  %v123_v20 = vld [vmem:[%s1485_s3 + $0xc0] sm:$0xff]  ;;  %1191 = vset.pattern.permute.xlu0 %v1229_v30  ;;  %vm508_vm4 = vcmask 326656   ;;  %vm688_vm5 = vcmask 261120   ;;  %vm1231_vm6 = vmmov 0  }
   0x9   :  { %1097 = vmatpush3.bf16.msra.mxu1 %v1094_v6  ;;  %v1110_v19 = vpack.c.bf16 %v122_v18, %v121_v17  ;;  %v124_v21 = vld [vmem:[%s1485_s3 + $0xc8] sm:$0xff]  ;;  %v125_v23 = vld [vmem:[%s1485_s3 + $0xd0] sm:$0xff]  ;;  %v126_v24 = vld [vmem:[%s1485_s3 + $0xd8] sm:$0xff]  ;;  %1192 = vset.pattern.permute.xlu1 %v1229_v30  ;;  %v207_v43 = vand.u32 127, %v206_v41  ;;  %s1233_s24 = smov [#allocation2]   ;;  %vm864_vm8 = vcmask 122880  }
   0xa   :  { %1099 = vmatprep.subr.bf16.mxu1 %v1098_v10  ;;  %v1114_v22 = vpack.c.bf16 %v124_v21, %v123_v20  ;;  %v1118_v25 = vpack.c.bf16 %v126_v24, %v125_v23  ;;  %v127_v26 = vld [vmem:[%s1485_s3 + $0xe0] sm:$0xff]  ;;  %v128_v27 = vld [vmem:[%s1485_s3 + $0xe8] sm:$0xff]  ;;  %v880_v32 = vld [vmem:[%s1485_s3 + $0x178] ss:$0 sm:$0xff]  ;;  %s872_s25 = sshll.u32 %s1233_s24, 4  ;;  %s873_s25 = int_to_ptr.vmem [resolvable:$true] %s872_s25 }
   0xb   :  { %v1122_v28 = vpack.c.bf16 %v128_v27, %v127_v26  ;;  %v208_v29 = vld [vmem:[%s1482_s0] sm:$0xff]  ;;  %v209_v31 = vld [vmem:[%s1482_s0 + $0x8] sm:$0xff]  ;;  %v1344_v37 = vld [vmem:[%s1483_s1 + $0x10] sm:$0xff]  ;;  %s1205_s26 = scalar_lea.vmem %s873_s25, 16  ;;  %p1210_p1 = scmp.lt.s32.totalorder %s873_s25, %s873_s25 }
   0xc   :  { %211 = vperm.xlu0 %1191, %v208_v29   ;;  %v1339_v35 = vld [vmem:[%s1483_s1] sm:$0xff]  ;;  %v243_v61 = vld [vmem:[%s1485_s3 + $0x170] sm:$0xff]  ;;  %v326_v63 = vld [vmem:[%s1485_s3 + $0xf8] sm:$0xff]  ;;  %p1206_p0 = scmp.ne.s32.totalorder %s873_s25, %s1205_s26 }
   0xd   :  { %1101 = vmatpush3.bf16.msra.mxu1 %v1098_v10  ;;  %1007 = vmatprep.subr.mxu0 %v243_v61  ;;  %v325_v62 = vld [vmem:[%s1485_s3 + $0xf0] sm:$0xff]  ;;  %v327_v6 = vld [vmem:[%s1485_s3 + $0x100] sm:$0xff]  ;;  %v328_v7 = vld [vmem:[%s1485_s3 + $0x108] sm:$0xff] }
   0xe   :  { %1103 = vmatprep.subr.bf16.mxu1 %v1102_v13  ;;  %1008 = vmatpush3.msra.mxu0 %v243_v61  ;;  %v1126_v0 = vpack.c.bf16 %v326_v63, %v325_v62  ;;  %v1130_v11 = vpack.c.bf16 %v328_v7, %v327_v6  ;;  %v329_v12 = vld [vmem:[%s1485_s3 + $0x110] sm:$0xff]  ;;  %v331_v15 = vld [vmem:[%s1485_s3 + $0x120] sm:$0xff]  ;;  %v1232_v61 = vmov 0.0   ;;  %v773_v62 = vld [vmem:[%s1485_s3 + $0x198] sm:$0x1] }
   0xf   :  { %v333_v18 = vld [vmem:[%s1485_s3 + $0x130] sm:$0xff]  ;;  %v335_v21 = vld [vmem:[%s1485_s3 + $0x140] sm:$0xff]  ;;  %v892_v63 = vld [vmem:[%s1485_s3 + $0x188] ss:$0 sm:$0xff] }
  0x10   :  { %214 = vperm.xlu0 %1191, %v209_v31   ;;  %1127 = vmatprep.subr.bf16.mxu0 %v1126_v0  ;;  %v337_v24 = vld [vmem:[%s1485_s3 + $0x150] sm:$0xff]  ;;  %v339_v27 = vld [vmem:[%s1485_s3 + $0x160] sm:$0xff]  ;;  %v425_v31 = vld [vmem:[%s1485_s3 + $0x48] sm:$0xff] }
  0x11   :  { %1105 = vmatpush3.bf16.msra.mxu1 %v1102_v13  ;;  %v330_v13 = vld [vmem:[%s1485_s3 + $0x118] sm:$0xff]  ;;  %v424_v30 = vld [vmem:[%s1485_s3 + $0x40] sm:$0xff]  ;;  %vm1180_vm7 = vmpackc.low %vm31_vm0, %vm31_vm0 }
  0x12   :  { %1107 = vmatprep.subr.bf16.mxu1 %v1106_v16  ;;  %v1134_v14 = vpack.c.bf16 %v330_v13, %v329_v12 }
  0x15   :  { %1109 = vmatpush3.bf16.msra.mxu1 %v1106_v16  ;;  %v332_v16 = vld [vmem:[%s1485_s3 + $0x128] sm:$0xff] }
  0x16   :  { %1111 = vmatprep.subr.bf16.mxu1 %v1110_v19  ;;  %v1138_v17 = vpack.c.bf16 %v332_v16, %v331_v15 }
  0x19   :  { %1113 = vmatpush3.bf16.msra.mxu1 %v1110_v19  ;;  %v334_v19 = vld [vmem:[%s1485_s3 + $0x138] sm:$0xff] }
  0x1a   :  { %1115 = vmatprep.subr.bf16.mxu1 %v1114_v22  ;;  %v1142_v20 = vpack.c.bf16 %v334_v19, %v333_v18 }
  0x1d   :  { %1117 = vmatpush3.bf16.msra.mxu1 %v1114_v22  ;;  %v336_v22 = vld [vmem:[%s1485_s3 + $0x148] sm:$0xff] }
  0x1e   :  { %1119 = vmatprep.subr.bf16.mxu1 %v1118_v25  ;;  %v1146_v23 = vpack.c.bf16 %v336_v22, %v335_v21 }
  0x21   :  { %1121 = vmatpush3.bf16.msra.mxu1 %v1118_v25  ;;  %v338_v25 = vld [vmem:[%s1485_s3 + $0x158] sm:$0xff] }
  0x22   :  { %1123 = vmatprep.subr.bf16.mxu1 %v1122_v28  ;;  %v1150_v26 = vpack.c.bf16 %v338_v25, %v337_v24 }
  0x25   :  { %1125 = vmatpush3.bf16.msra.mxu1 %v1122_v28  ;;  %v340_v28 = vld [vmem:[%s1485_s3 + $0x168] sm:$0xff] }
  0x26   :  { %v1154_v29 = vpack.c.bf16 %v340_v28, %v339_v27 }
  0x8b   :  { %v212_v42 = vpop.permute.xlu0 %211 }
  0x8c   :  { %vm216_vm1 = vcmp.lt.s32.totalorder %v207_v43, %v212_v42  ;;  %v679_v42 = vld [vmem:[%s1485_s3 + $0x50] sm:$0xff] }
  0x8f   :  { %v215_v44 = vpop.permute.xlu0 %214 }
  0x90   :  { %vm217_vm3 = vcmp.lt.s32.totalorder %v207_v43, %v215_v44  ;;  %v420_v43 = vld [vmem:[%s1485_s3 + $0x20] sm:$0xff]  ;;  %v421_v44 = vld [vmem:[%s1485_s3 + $0x28] sm:$0xff] }
  0xdb   :  { %v971_v33 = vpop.f32.mrb[0].mxu1 }
  0xdc   :  { %v110_v34 = vadd.f32 %v971_v33, %v880_v32  ;;  %v104_v36 = vpop.f32.mrb[1].mxu1 }
  0xdd   :  { %v105_v38 = vadd.f32 %v880_v32, %v104_v36  ;;  %v1158_v32 = vpack.c.bf16 %v425_v31, %v424_v30 }
  0xde   :  { %v130_v40 = vmul.f32 %v110_v34, %v1344_v37 }
  0xdf   :  { %v129_v39 = vmul.f32 %v105_v38, %v1339_v35  ;;  %1159 = vmatprep.subr.bf16.mxu1 %v1158_v32 }
  0xe1   :  { %1004 = vmatprep.mubr.f32.mxu1 %v129_v39  ;;  %v418_v39 = vld [vmem:[%s1485_s3 + $0x10] sm:$0xff] }
  0xe2   :  { %1005 = vmatmul.mubr.f32.vlgmr.msra.gmra.mrb[2].mxu1 %v130_v40  ;;  %v419_v40 = vld [vmem:[%s1485_s3 + $0x18] sm:$0xff] }
  0xe3   :  { %1161 = vmatpush3.bf16.msra.mxu1 %v1158_v32  ;;  %v1162_v41 = vpack.c.bf16 %v419_v40, %v418_v39 }
  0xe5   :  { %1163 = vmatprep.subr.bf16.mxu1 %v1162_v41 }
 0x1b5   :  { %v1006_v45 = vpop.f32.mrb[2].mxu1 }
 0x1b6   :  { %v197_v46 = vpop.f32.mrb[3].mxu1  ;;  %v219_v49 = vsel %vm217_vm3, %v1006_v45, -1e+09 }
 0x1b7   :  { %v218_v47 = vsel %vm216_vm1, %v197_v46, -1e+09  ;;  %v224_v50 = vsel %vm220_vm2, %v219_v49, -inf }
 0x1b8   :  { %v221_v48 = vsel %vm220_vm2, %v218_v47, -inf }
 0x1b9   :  { %222 = vmax.xlane.f32.xlu1 %v221_v48  ;;  %v422_v48 = vld [vmem:[%s1485_s3 + $0x30] sm:$0xff] }
 0x1bd   :  { %225 = vmax.xlane.f32.xlu1 %v224_v50  ;;  %v22_v50 = vld [vmem:[%s1484_s2] sm:$0xff] }
 0x246   :  { %v223_v51 = vpop.xlane.xlu1 %222 }
 0x247   :  { %v227_v52 = vsub.f32 %v218_v47, %v223_v51  ;;  %v1166_v47 = vpack.c.bf16 %v421_v44, %v420_v43  ;;  %v681_v51 = vld [vmem:[%s1485_s3 + $0x60] sm:$0xff] }
 0x249   :  { %v229_v53 = vmul.f32 1.442695, %v227_v52  ;;  %v682_v52 = vld [vmem:[%s1485_s3 + $0x68] sm:$0xff] }
 0x24a   :  { %v226_v54 = vpop.xlane.xlu1 %225 }
 0x24b   :  { %1193 = vpow2.f32 %v229_v53  ;;  %v228_v55 = vsub.f32 %v219_v49, %v226_v54  ;;  %v423_v49 = vld [vmem:[%s1485_s3 + $0x38] sm:$0xff]  ;;  %v1174_v53 = vpack.c.bf16 %v682_v52, %v681_v51 }
 0x24d   :  { %v231_v56 = vmul.f32 1.442695, %v228_v55 }
 0x24f   :  { %1195 = vpow2.f32 %v231_v56 }
 0x255   :  { %v1194_v57 = vpop.eup %1193 }
 0x256   :  { %v233_v58 = vsel %vm220_vm2, %v1194_v57, 0.0 }
 0x257   :  { %234 = vadd.xlane.f32.xlu0 %v233_v58 }
 0x259   :  { %v1196_v59 = vpop.eup %1195 }
 0x25a   :  { %v236_v60 = vsel %vm220_vm2, %v1196_v59, 0.0 }
 0x25b   :  { %237 = vadd.xlane.f32.xlu1 %v236_v60  ;;  %v1230_v60 = vmov 0.0|0.0  }
 0x26c   :  { %776 = vperm.xlu1 %1192, %v773_v62  }
 0x2e4   :  { %v235_v1 = vpop.xlane.xlu0 %234 }
 0x2e5   :  { %1197 = vrcp.f32 %v235_v1 }
 0x2e8   :  { %v238_v3 = vpop.xlane.xlu1 %237 }
 0x2e9   :  { %1199 = vrcp.f32 %v238_v3 }
 0x2ef   :  { %v1198_v4 = vpop.eup %1197 }
 0x2f0   :  { %v241_v5 = vmul.f32 %v1198_v4, %v1194_v57 }
 0x2f2   :  { %1009 = vmatprep.mubr.msk.f32.mxu0 %vm220_vm2, %v241_v5 }
 0x2f3   :  { %v1200_v8 = vpop.eup %1199 }
 0x2f4   :  { %v242_v10 = vmul.f32 %v1200_v8, %v1196_v59  ;;  %v772_v8 = vld [vmem:[%s1485_s3 + $0x190] sm:$0x1] }
 0x2f6   :  { %1010 = vmatmul.mubr.msk.f32.vlgmr.msra.gmra.mrb[0].mxu0 %vm220_vm2, %v242_v10  ;;  %v777_v10 = vpop.permute.xlu1 %776 }
 0x2f7   :  { %1129 = vmatpush3.bf16.msra.mxu0 %v1126_v0 }
 0x2f8   :  { %1131 = vmatprep.subr.bf16.mxu0 %v1130_v11 }
 0x2fb   :  { %1133 = vmatpush3.bf16.msra.mxu0 %v1130_v11 }
 0x2fc   :  { %1135 = vmatprep.subr.bf16.mxu0 %v1134_v14 }
 0x2ff   :  { %1137 = vmatpush3.bf16.msra.mxu0 %v1134_v14 }
 0x300   :  { %1139 = vmatprep.subr.bf16.mxu0 %v1138_v17 }
 0x303   :  { %1141 = vmatpush3.bf16.msra.mxu0 %v1138_v17 }
 0x304   :  { %1143 = vmatprep.subr.bf16.mxu0 %v1142_v20 }
 0x307   :  { %1145 = vmatpush3.bf16.msra.mxu0 %v1142_v20 }
 0x308   :  { %1147 = vmatprep.subr.bf16.mxu0 %v1146_v23 }
 0x30b   :  { %1149 = vmatpush3.bf16.msra.mxu0 %v1146_v23 }
 0x30c   :  { %1151 = vmatprep.subr.bf16.mxu0 %v1150_v26 }
 0x30f   :  { %1153 = vmatpush3.bf16.msra.mxu0 %v1150_v26 }
 0x310   :  { %1155 = vmatprep.subr.bf16.mxu0 %v1154_v29 }
 0x313   :  { %1157 = vmatpush3.bf16.msra.mxu0 %v1154_v29 }
 0x3c9   :  { %v1011_v33 = vpop.f32.mrb[0].mxu0 }
 0x3ca   :  { %v316_v34 = vpop.f32.mrb[1].mxu0  ;;  %v342_v38 = vmul.f32 %v1011_v33, %v1344_v37 }
 0x3cb   :  { %v341_v36 = vmul.f32 %v316_v34, %v1339_v35  ;;  %v680_v35 = vld [vmem:[%s1485_s3 + $0x58] sm:$0xff] }
 0x3cc   :  { %v1170_v37 = vpack.c.bf16 %v680_v35, %v679_v42 }
 0x3cd   :  { %1044 = vmatprep.mubr.f32.mxu0 %v341_v36 }
 0x3ce   :  { %1045 = vmatmul.mubr.f32.vlgmr.msra.gmra.mrb[2].mxu0 %v342_v38  ;;  %1171 = vmatprep.subr.bf16.mxu0 %v1170_v37 }
 0x3cf   :  { %1173 = vmatpush3.bf16.msra.mxu0 %v1170_v37 }
 0x3d0   :  { %1175 = vmatprep.subr.bf16.mxu0 %v1174_v53 }
 0x3d3   :  { %1177 = vmatpush3.bf16.msra.mxu0 %v1174_v53 }
 0x3d4   :  { %1178 = vmatprep.subr.bf16.mxu0 %v1230_v60 }
 0x4a1   :  { %v1046_v45 = vpop.f32.mrb[2].mxu0 }
 0x4a2   :  { %v409_v46 = vpop.f32.mrb[3].mxu0 }
 0x4a3   :  { %1051 = vmatprep.mubr.msk.f32.mxu1 %vm31_vm0, %v409_v46 }
 0x4a4   :  { %1052 = vmatmul.mubr.msk.f32.vlgmr.msra.gmra.mrb[4].mxu1 %vm31_vm0, %v1046_v45 }
 0x4a5   :  { %1165 = vmatpush3.bf16.msra.mxu1 %v1162_v41  ;;  %1064 = vmatprep.mubr.msk.f32.mxu1 %vm508_vm4, %v1268_v2  ;;  %v23_v2 = vld [vmem:[%s1484_s2 + $0x8] sm:$0xff] }
 0x4a6   :  { %1167 = vmatprep.subr.bf16.mxu1 %v1166_v47 }
 0x4a9   :  { %1169 = vmatpush3.bf16.msra.mxu1 %v1166_v47 }
 0x4aa   :  { %1062 = vmatprep.subr.mxu1 %v422_v48 }
 0x4ad   :  { %1063 = vmatpush3.msra.mxu1 %v422_v48 }
 0x4ae   :  { %1065 = vmatmul.mubr.msk.f32.vlgmr.msra.gmra.mrb[4].mxu1 %vm508_vm4, %v1287_v9  ;;  %1067 = vmatprep.subr.mxu1 %v423_v49  ;;  %v891_v9 = vld [vmem:[%s1485_s3 + $0x180] ss:$0 sm:$0xff]  ;;  %s1209_s3 = scalar_lea.vmem %s873_s25, 32 }
 0x4af   :  { %1068 = vmatpush3.msra.mxu1 %v423_v49  ;;  %1069 = vmatprep.mubr.msk.f32.mxu1 %vm220_vm2, %v22_v50  ;;  %p1211_p2 = scmp.lt.s32.totalorder %s1209_s3, %s1205_s26 }
 0x4b1   :  { %p1212_p3 = por %p1211_p2, %p1210_p1 }
 0x4b3   :  { %p1213_p4 = pnand %p1212_p3, %p1206_p0 }
 0x4b6   :  { %1070 = vmatmul.mubr.msk.f32.vlgmr.msra.gmra.mrb[4].mxu1 %vm220_vm2, %v23_v2 }
 0x589   :  { %v1071_v54 = vpop.f32.mrb[4].mxu1 }
 0x58a   :  { %v676_v55 = vadd.f32 %v1071_v54, %v891_v9  ;;  %v660_v56 = vpop.f32.mrb[5].mxu1 }
 0x58b   :  { %v675_v57 = vadd.f32 %v891_v9, %v660_v56 }
 0x58c   :  { %v678_v59 = vmax.f32 %v676_v55, 0.0 }
 0x58d   :  { %v677_v58 = vmax.f32 %v675_v57, 0.0 }
 0x58f   :  { %1080 = vmatprep.mubr.msk.f32.mxu0 %vm688_vm5, %v677_v58 }
 0x590   :  { %1081 = vmatmul.mubr.msk.f32.vlgmr.msra.gmra.mrb[4].mxu0 %vm688_vm5, %v678_v59 }
 0x591   :  { %1087 = vmatprep.mubr.msk.f32.mxu0 %vm1231_vm6, %v1232_v61 }
 0x663   :  { %v1082_v0 = vpop.f32.mrb[4].mxu0 }
 0x664   :  { %v767_v1 = vadd.f32 %v1082_v0, %v892_v63  ;;  %v761_v3 = vpop.f32.mrb[5].mxu0 }
 0x665   :  { %v762_v4 = vadd.f32 %v892_v63, %v761_v3 }
 0x666   :  { %v771_v5 = vmax.f32 %v767_v1, 0.0 }
 0x667   :  { %v770_v6 = vmax.f32 %v762_v4, 0.0 }
 0x669   :  { %v1179_v7 = vpack.c.bf16 %v771_v5, %v770_v6 }
 0x66b   :  { %1181 = vmatpush3.bf16.xpose.msk.msra.mxu0 %vm1180_vm7, %v1179_v7 }
 0x672   :  { %1088 = vmatmul.mubr.msk.f32.vlgmr.msra.gmra.mrb[6].mxu0 %vm31_vm0, %v772_v8 }
 0x745   :  { %v854_v11 = vpop.f32.mrb[6].mxu0 }
 0x746   :  { %v1089_v12 = vpop.f32.mrb[7].mxu0  ;;  %v855_v13 = vadd.f32 %v854_v11, %v777_v10 }
 0x748   :  { %v898_v14 = vmul.f32 -1.442695, %v855_v13 }
 0x74a   :  { %1201 = vpow2.f32 %v898_v14 }
 0x754   :  { %v1202_v15 = vpop.eup %1201 }
 0x755   :  { %v861_v16 = vadd.f32 1.0, %v1202_v15 }
 0x757   :  { %1203 = vrcp.f32 %v861_v16 }
 0x761   :  { %v1204_v17 = vpop.eup %1203 }
 0x762   :  { %865 = vst.msk [vmem:[#allocation2] sm:$0x1] %vm864_vm8, %v1204_v17 }
 0x763   :  { %1216 = shalt.err (!%p1213_p4)
}
 0x764   :  { %s1217_s29 = scalar_lea.hbm %s1486_s4, 16 }
 0x765   :  { %p1218_p5 = scmp.ne.s32.totalorder %s1486_s4, %s1217_s29  ;;  %p1221_p6 = scmp.lt.u32.totalorder %s1217_s29, %s1486_s4 }
 0x767   :  { %p1223_p7 = pnand %p1221_p6, %p1218_p5 }
 0x769   :  { %1226 = shalt.err (!%p1223_p7)
}
 0x76a   :  { %875 = dma.vmem_to_hbm [thread:$0]  %s873_s25, 16, %s1486_s4, [#allocation3]  }
 0x76b   :  { %1227 = dma.done.wait [#allocation3], 16  }
 0x76c   :  { %1228 = vsyncadd [#allocation3], 4294967280 }
 0x76d   :  { %879 = vsyncpa [#allocation3], 1 }

</bundles_post_ra>
